<compile_context>
chip_gen: v7x
topology: tpu7x:2x2x1
jax: 0.10.0
libtpu: 0.0.40
codegen_flags: <defaults>
</compile_context>

<pallas_src>
import functools

import jax
import jax.numpy as jnp
from jax import lax
from jax.experimental import pallas as pl
from jax.experimental.pallas import tpu as pltpu

BETA = 0.9
EPS = 1e-9
LOWER_CUTOFF = 0.05
UPPER_CUTOFF = 0.3
LANES = 128
_SUB_ROWS = 32     # rows per accumulation window on the dense (F % 128 == 0) path
_SUB_LANES = 512   # lanes per accumulation window on the ragged path


def _round_up(a, b):
    return (a + b - 1) // b * b


def _vmem_limit_bytes():
    """Scoped-VMEM request: half of physical VMEM (64 MiB v5e/v6e, 32 MiB v7x)."""
    cap = None
    try:
        cap = getattr(pltpu.get_tpu_info(), "vmem_capacity_bytes", None)
    except Exception:
        cap = None
    if not cap:
        cap = 64 * 1024 * 1024   # conservative default (v7x per-TensorCore VMEM)
    return int(min(cap // 2, 64 * 1024 * 1024))


def _ftl_partials_kernel(x_ref, t_ref, out_ref, *, win_rows, win_cols, nwin,
                         f_total, needs_mask, ragged, unroll):
    """Per-(sample, chunk) partial sums [sum(x), sum(t), sum(t*x)].

    x_ref/t_ref: (1, bR, bC) tile of one sample's features.
    out_ref:     (1, 1, 3, win_cols) lane-dense partial sums.
    """
    k = pl.program_id(1)
    block_elems = x_ref.shape[1] * x_ref.shape[2]
    win_elems = win_rows * win_cols

    def window(ref, i):
        if ragged:   # features live on the lane axis: step along lanes
            c0 = pl.multiple_of(i * win_cols, win_cols)
            return ref[0, :, pl.ds(c0, win_cols)]
        r0 = pl.multiple_of(i * win_rows, win_rows)   # step along sublane rows
        return ref[0, pl.ds(r0, win_rows), :]

    def run(mask_tail):
        def body(i, carry):
            sx, st, stx = carry
            x = window(x_ref, i)
            t = window(t_ref, i)
            xf = x.astype(jnp.float32)
            tf = t.astype(jnp.float32)
            if x.dtype == t.dtype and jnp.issubdtype(x.dtype, jnp.floating):
                # bf16 inputs: packed multiply in the native dtype, cast once.
                pf = (x * t).astype(jnp.float32)
            else:
                pf = xf * tf
            if mask_tail:
                # Mask features past the true end (partial last chunk -> the
                # out-of-bounds region of the block holds unspecified data).
                base = k * block_elems + i * win_elems
                r_id = lax.broadcasted_iota(jnp.int32, (win_rows, win_cols), 0)
                c_id = lax.broadcasted_iota(jnp.int32, (win_rows, win_cols), 1)
                valid = (base + r_id * win_cols + c_id) < f_total
                xf = jnp.where(valid, xf, 0.0)
                tf = jnp.where(valid, tf, 0.0)
                pf = jnp.where(valid, pf, 0.0)
            return sx + xf, st + tf, stx + pf

        zero = jnp.zeros((win_rows, win_cols), jnp.float32)
        sx, st, stx = lax.fori_loop(0, nwin, body, (zero, zero, zero),
                                    unroll=unroll)
        out_ref[0, 0, :, :] = jnp.concatenate(
            [jnp.sum(sx, axis=0, keepdims=True),
             jnp.sum(st, axis=0, keepdims=True),
             jnp.sum(stx, axis=0, keepdims=True)], axis=0)

    if not needs_mask:
        run(False)
    else:
        last = pl.num_programs(1) - 1

        @pl.when(k != last)
        def _():
            run(False)

        @pl.when(k == last)
        def _():
            run(True)


def focal_tversky_loss(inp, tgt):
    """inp, tgt: (N, C, H, W) probabilities / binary mask.  Returns scalar f32 loss."""
    N, C, H, W = inp.shape
    F = C * H * W

    x_item = jnp.dtype(inp.dtype).itemsize
    t_item = jnp.dtype(tgt.dtype).itemsize
    itemsize = max(x_item, t_item)

    vmem_limit = _vmem_limit_bytes()
    # 2 inputs x 2 pipeline buffers use at most half the scoped limit.
    block_budget = vmem_limit // 8

    if F % LANES == 0:
        # Dense path: each sample's features viewed (free reshape) as
        # (rows, 128); sublanes fully used regardless of N.
        rows = F // LANES
        win_rows, win_cols = _SUB_ROWS, LANES
        bR = max(win_rows,
                 block_budget // (LANES * itemsize) // win_rows * win_rows)
        bR = min(bR, _round_up(rows, win_rows))
        if N == 1 and rows > win_rows:
            # keep >= 2 feature chunks so both v7x TensorCores get work
            bR = min(bR, _round_up(pl.cdiv(rows, 2), win_rows))
        num_chunks = pl.cdiv(rows, bR)
        needs_mask = (rows % bR) != 0
        nwin = bR // win_rows
        x = inp.reshape(N, rows, LANES)
        t = tgt.reshape(N, rows, LANES)
        block = (1, bR, LANES)
        in_map = lambda n, k: (n, k, 0)
        ragged = False
    else:
        # Ragged path: features stay on the lane axis, UNPADDED; the tail of
        # the final chunk is masked in-kernel (no extra HBM copy from jnp.pad).
        win_rows, win_cols = 1, _SUB_LANES
        # The single sublane row pads to 8 in VMEM -> factor 8 in the budget.
        bL = max(win_cols,
                 block_budget // (8 * itemsize) // win_cols * win_cols)
        bL = min(bL, _round_up(F, win_cols))
        if N == 1 and F > win_cols:
            bL = min(bL, _round_up(pl.cdiv(F, 2), win_cols))
        num_chunks = pl.cdiv(F, bL)
        needs_mask = (F % bL) != 0
        nwin = bL // win_cols
        x = inp.reshape(N, 1, F)
        t = tgt.reshape(N, 1, F)
        block = (1, 1, bL)
        in_map = lambda n, k: (n, 0, k)
        ragged = True

    kernel = functools.partial(
        _ftl_partials_kernel, win_rows=win_rows, win_cols=win_cols, nwin=nwin,
        f_total=F, needs_mask=needs_mask, ragged=ragged,
        unroll=2 if nwin >= 2 else 1)

    out_bytes = N * num_chunks * 3 * win_cols * 4
    cost_est = pl.CostEstimate(
        flops=int(5 * N * F),
        transcendentals=0,
        bytes_accessed=int(N * F * (x_item + t_item) + out_bytes))

    partials = pl.pallas_call(
        kernel,
        out_shape=jax.ShapeDtypeStruct((N, num_chunks, 3, win_cols), jnp.float32),
        grid_spec=pltpu.PrefetchScalarGridSpec(
            num_scalar_prefetch=0,
            grid=(N, num_chunks),
            in_specs=[pl.BlockSpec(block, in_map),
                      pl.BlockSpec(block, in_map)],
            out_specs=pl.BlockSpec((1, 1, 3, win_cols),
                                   lambda n, k: (n, k, 0, 0)),
        ),
        compiler_params=pltpu.CompilerParams(
            dimension_semantics=("parallel", "parallel"),
            vmem_limit_bytes=vmem_limit,
        ),
        cost_estimate=cost_est,
    )(x, t)

    # --- tiny finalize in plain JAX (Tversky index, gamma, pow, batch mean) ---
    sums = jnp.sum(partials, axis=(1, 3))             # (N, 3): [sum x, sum t, sum t*x]
    sx, st, stx = sums[:, 0], sums[:, 1], sums[:, 2]
    nr = stx
    dr = BETA * sx + (1.0 - BETA) * st                 # exact identity: t*x terms cancel
    tversky = nr / (dr + EPS)
    cost = jnp.maximum(1.0 - tversky, 0.0)             # clamp fp-noise negatives (pow NaN guard)

    # compute_gamma (stateless / first-forward-call semantics)
    pf = st / jnp.float32(F)
    pf = jnp.clip(pf, LOWER_CUTOFF, UPPER_CUTOFF)
    min_, max_ = jnp.min(pf), jnp.max(pf)
    gammas = 3.0 * (pf - min_) / (max_ - min_ + 1e-9)
    # TODO(synk): the torch module's running _min_ratio/_max_ratio buffers across
    # forward calls are not representable in a stateless kernel; first-call
    # (batch min/max) semantics are reproduced here.

    return jnp.mean(jnp.power(cost, gammas))


def _reference(inp, tgt):
    """Pure-JAX reference mirroring the torch forward (first call)."""
    x = inp.astype(jnp.float32)
    t = tgt.astype(jnp.float32)
    nr = t * x
    dr = nr + BETA * (1.0 - t) * x + (1.0 - BETA) * t * (1.0 - x)
    nr_s = jnp.sum(nr, axis=(1, 2, 3), keepdims=True)
    dr_s = jnp.sum(dr, axis=(1, 2, 3), keepdims=True)
    cost = 1.0 - nr_s / (dr_s + EPS)
    pf = jnp.mean(t, axis=(1, 2, 3), keepdims=True)
    pf = jnp.clip(pf, LOWER_CUTOFF, UPPER_CUTOFF)
    gammas = 3.0 * (pf - jnp.min(pf)) / (jnp.max(pf) - jnp.min(pf) + 1e-9)
    return jnp.mean(jnp.power(cost, gammas))


if __name__ == "__main__":
    key = jax.random.PRNGKey(0)
    k_in, k_tg, k_in2, k_tg2 = jax.random.split(key, 4)

    loss_fn = jax.jit(focal_tversky_loss)

    # Case 1: features are a clean multiple of 128 (dense path, no masking).
    N, C, H, W = 2, 4, 16, 16
    inp = jax.nn.sigmoid(jax.random.normal(k_in, (N, C, H, W), jnp.float32))
    tgt = (jax.random.uniform(k_tg, (N, C, H, W), jnp.float32) < 0.15).astype(
        jnp.float32)
    loss = jax.block_until_ready(loss_fn(inp, tgt))
    ref = _reference(inp, tgt)
    assert jnp.allclose(loss, ref, rtol=5e-5, atol=1e-6), (loss, ref)

    # Case 2: ragged feature count (exercises the pad-free in-kernel masking path).
    N2, C2, H2, W2 = 3, 3, 10, 7
    inp2 = jax.nn.sigmoid(jax.random.normal(k_in2, (N2, C2, H2, W2), jnp.float32))
    tgt2 = (jax.random.uniform(k_tg2, (N2, C2, H2, W2), jnp.float32) < 0.2).astype(
        jnp.float32)
    loss2 = jax.block_until_ready(loss_fn(inp2, tgt2))
    ref2 = _reference(inp2, tgt2)
    assert jnp.allclose(loss2, ref2, rtol=5e-5, atol=1e-6), (loss2, ref2)

    print("KERNEL_OK")
</pallas_src>

<mosaic_0001>
module attributes {stable_mosaic.version = 11 : i64} {
  func.func @_ftl_partials_kernel(%arg0: i32, %arg1: i32, %arg2: memref<1x32x128xf32, #tpu.memory_space<vmem>>, %arg3: memref<1x32x128xf32, #tpu.memory_space<vmem>>, %arg4: memref<1x1x3x128xf32, #tpu.memory_space<vmem>>) attributes {dimension_semantics = [#tpu.dimension_semantics<parallel>, #tpu.dimension_semantics<parallel>], iteration_bounds = array<i64: 2, 1>, scalar_prefetch = 0 : i64, scratch_operands = 0 : i64, tpu.core_type = #tpu.core_type<tc>, window_params = [{transform_indices = @transform_0, window_bounds = array<i64: 1, 32, 128>}, {transform_indices = @transform_1, window_bounds = array<i64: 1, 32, 128>}, {transform_indices = @transform_2, window_bounds = array<i64: 1, 1, 3, 128>}]} {
    %c0_i32 = arith.constant 0 : i32
    %0 = arith.cmpi ne, %arg1, %c0_i32 : i32
    %1 = arith.extui %0 : i1 to i32
    %c0_i32_0 = arith.constant 0 : i32
    %2 = arith.cmpi ne, %1, %c0_i32_0 : i32
    scf.if %2 {
      %cst = arith.constant 0.000000e+00 : f32
      %6 = vector.broadcast %cst : f32 to vector<32x128xf32>
      %c0_i32_3 = arith.constant 0 : i32
      %c32_i32 = arith.constant 32 : i32
      %7 = arith.muli %c0_i32_3, %c32_i32 : i32
      %8 = tpu.assume_multiple %7, 32 : i32
      %c0 = arith.constant 0 : index
      %9 = arith.index_cast %8 : i32 to index
      %c0_4 = arith.constant 0 : index
      %10 = vector.load %arg2[%c0, %9, %c0_4] : memref<1x32x128xf32, #tpu.memory_space<vmem>>, vector<1x32x128xf32>
      %11 = vector.shape_cast %10 : vector<1x32x128xf32> to vector<32x128xf32>
      %c32_i32_5 = arith.constant 32 : i32
      %12 = arith.muli %c0_i32_3, %c32_i32_5 : i32
      %13 = tpu.assume_multiple %12, 32 : i32
      %c0_6 = arith.constant 0 : index
      %14 = arith.index_cast %13 : i32 to index
      %c0_7 = arith.constant 0 : index
      %15 = vector.load %arg3[%c0_6, %14, %c0_7] : memref<1x32x128xf32, #tpu.memory_space<vmem>>, vector<1x32x128xf32>
      %16 = vector.shape_cast %15 : vector<1x32x128xf32> to vector<32x128xf32>
      %17 = arith.mulf %11, %16 : vector<32x128xf32>
      %18 = arith.addf %6, %11 : vector<32x128xf32>
      %19 = arith.addf %6, %16 : vector<32x128xf32>
      %20 = arith.addf %6, %17 : vector<32x128xf32>
      %c1_i32 = arith.constant 1 : i32
      %cst_8 = arith.constant dense<0.000000e+00> : vector<128xf32>
      %21 = vector.multi_reduction <add>, %18, %cst_8 [0] : vector<32x128xf32> to vector<128xf32>
      %22 = vector.shape_cast %21 : vector<128xf32> to vector<1x128xf32>
      %cst_9 = arith.constant dense<0.000000e+00> : vector<128xf32>
      %23 = vector.multi_reduction <add>, %19, %cst_9 [0] : vector<32x128xf32> to vector<128xf32>
      %24 = vector.shape_cast %23 : vector<128xf32> to vector<1x128xf32>
      %cst_10 = arith.constant dense<0.000000e+00> : vector<128xf32>
      %25 = vector.multi_reduction <add>, %20, %cst_10 [0] : vector<32x128xf32> to vector<128xf32>
      %26 = vector.shape_cast %25 : vector<128xf32> to vector<1x128xf32>
      %27 = tpu.concatenate %22, %24, %26 in 0 : vector<1x128xf32>, vector<1x128xf32>, vector<1x128xf32> -> vector<3x128xf32>
      %c0_11 = arith.constant 0 : index
      %c0_12 = arith.constant 0 : index
      %c0_13 = arith.constant 0 : index
      %c0_14 = arith.constant 0 : index
      %28 = vector.load %arg4[%c0_11, %c0_12, %c0_13, %c0_14] : memref<1x1x3x128xf32, #tpu.memory_space<vmem>>, vector<1x1x3x128xf32>
      %29 = vector.shape_cast %28 : vector<1x1x3x128xf32> to vector<3x128xf32>
      %30 = vector.shape_cast %27 : vector<3x128xf32> to vector<1x1x3x128xf32>
      tpu.vector_store %arg4[%c0_11, %c0_12, %c0_13, %c0_14], %30 {strides = array<i32>} : memref<1x1x3x128xf32, #tpu.memory_space<vmem>>, vector<1x1x3x128xf32>,
    } else {
    }
    %c0_i32_1 = arith.constant 0 : i32
    %3 = arith.cmpi eq, %arg1, %c0_i32_1 : i32
    %4 = arith.extui %3 : i1 to i32
    %c0_i32_2 = arith.constant 0 : i32
    %5 = arith.cmpi ne, %4, %c0_i32_2 : i32
    scf.if %5 {
      %cst = arith.constant 0.000000e+00 : f32
      %6 = vector.broadcast %cst : f32 to vector<32x128xf32>
      %c0_i32_3 = arith.constant 0 : i32
      %c32_i32 = arith.constant 32 : i32
      %7 = arith.muli %c0_i32_3, %c32_i32 : i32
      %8 = tpu.assume_multiple %7, 32 : i32
      %c0 = arith.constant 0 : index
      %9 = arith.index_cast %8 : i32 to index
      %c0_4 = arith.constant 0 : index
      %10 = vector.load %arg2[%c0, %9, %c0_4] : memref<1x32x128xf32, #tpu.memory_space<vmem>>, vector<1x32x128xf32>
      %11 = vector.shape_cast %10 : vector<1x32x128xf32> to vector<32x128xf32>
      %c32_i32_5 = arith.constant 32 : i32
      %12 = arith.muli %c0_i32_3, %c32_i32_5 : i32
      %13 = tpu.assume_multiple %12, 32 : i32
      %c0_6 = arith.constant 0 : index
      %14 = arith.index_cast %13 : i32 to index
      %c0_7 = arith.constant 0 : index
      %15 = vector.load %arg3[%c0_6, %14, %c0_7] : memref<1x32x128xf32, #tpu.memory_space<vmem>>, vector<1x32x128xf32>
      %16 = vector.shape_cast %15 : vector<1x32x128xf32> to vector<32x128xf32>
      %17 = arith.mulf %11, %16 : vector<32x128xf32>
      %c4096_i32 = arith.constant 4096 : i32
      %18 = arith.muli %arg1, %c4096_i32 : i32
      %c4096_i32_8 = arith.constant 4096 : i32
      %19 = arith.muli %c0_i32_3, %c4096_i32_8 : i32
      %20 = arith.addi %18, %19 : i32
      %21 = tpu.iota {dimensions = array<i32: 0>} : vector<32x128xi32>
      %22 = tpu.iota {dimensions = array<i32: 1>} : vector<32x128xi32>
      %c128_i32 = arith.constant 128 : i32
      %23 = vector.broadcast %c128_i32 : i32 to vector<32x128xi32>
      %24 = arith.muli %21, %23 : vector<32x128xi32>
      %25 = vector.broadcast %20 : i32 to vector<32x128xi32>
      %26 = arith.addi %25, %24 : vector<32x128xi32>
      %27 = arith.addi %26, %22 : vector<32x128xi32>
      %c1024_i32 = arith.constant 1024 : i32
      %28 = vector.broadcast %c1024_i32 : i32 to vector<32x128xi32>
      %29 = arith.cmpi slt, %27, %28 : vector<32x128xi32>
      %cst_9 = arith.constant 0.000000e+00 : f32
      %30 = vector.broadcast %cst_9 : f32 to vector<32x128xf32>
      %31 = arith.select %29, %11, %30 : vector<32x128xi1>, vector<32x128xf32>
      %cst_10 = arith.constant 0.000000e+00 : f32
      %32 = vector.broadcast %cst_10 : f32 to vector<32x128xf32>
      %33 = arith.select %29, %16, %32 : vector<32x128xi1>, vector<32x128xf32>
      %cst_11 = arith.constant 0.000000e+00 : f32
      %34 = vector.broadcast %cst_11 : f32 to vector<32x128xf32>
      %35 = arith.select %29, %17, %34 : vector<32x128xi1>, vector<32x128xf32>
      %36 = arith.addf %6, %31 : vector<32x128xf32>
      %37 = arith.addf %6, %33 : vector<32x128xf32>
      %38 = arith.addf %6, %35 : vector<32x128xf32>
      %c1_i32 = arith.constant 1 : i32
      %cst_12 = arith.constant dense<0.000000e+00> : vector<128xf32>
      %39 = vector.multi_reduction <add>, %36, %cst_12 [0] : vector<32x128xf32> to vector<128xf32>
      %40 = vector.shape_cast %39 : vector<128xf32> to vector<1x128xf32>
      %cst_13 = arith.constant dense<0.000000e+00> : vector<128xf32>
      %41 = vector.multi_reduction <add>, %37, %cst_13 [0] : vector<32x128xf32> to vector<128xf32>
      %42 = vector.shape_cast %41 : vector<128xf32> to vector<1x128xf32>
      %cst_14 = arith.constant dense<0.000000e+00> : vector<128xf32>
      %43 = vector.multi_reduction <add>, %38, %cst_14 [0] : vector<32x128xf32> to vector<128xf32>
      %44 = vector.shape_cast %43 : vector<128xf32> to vector<1x128xf32>
      %45 = tpu.concatenate %40, %42, %44 in 0 : vector<1x128xf32>, vector<1x128xf32>, vector<1x128xf32> -> vector<3x128xf32>
      %c0_15 = arith.constant 0 : index
      %c0_16 = arith.constant 0 : index
      %c0_17 = arith.constant 0 : index
      %c0_18 = arith.constant 0 : index
      %46 = vector.load %arg4[%c0_15, %c0_16, %c0_17, %c0_18] : memref<1x1x3x128xf32, #tpu.memory_space<vmem>>, vector<1x1x3x128xf32>
      %47 = vector.shape_cast %46 : vector<1x1x3x128xf32> to vector<3x128xf32>
      %48 = vector.shape_cast %45 : vector<3x128xf32> to vector<1x1x3x128xf32>
      tpu.vector_store %arg4[%c0_15, %c0_16, %c0_17, %c0_18], %48 {strides = array<i32>} : memref<1x1x3x128xf32, #tpu.memory_space<vmem>>, vector<1x1x3x128xf32>,
    } else {
    }
    return
  }
  func.func @transform_0(%arg0: i32, %arg1: i32) -> (i32, i32, i32) {
    %c0_i32 = arith.constant 0 : i32
    %c0_i32_0 = arith.constant 0 : i32
    return %arg0, %arg1, %c0_i32 : i32, i32, i32
  }
  func.func @transform_1(%arg0: i32, %arg1: i32) -> (i32, i32, i32) {
    %c0_i32 = arith.constant 0 : i32
    %c0_i32_0 = arith.constant 0 : i32
    return %arg0, %arg1, %c0_i32 : i32, i32, i32
  }
  func.func @transform_2(%arg0: i32, %arg1: i32) -> (i32, i32, i32, i32) {
    %c0_i32 = arith.constant 0 : i32
    %c0_i32_0 = arith.constant 0 : i32
    %c0_i32_1 = arith.constant 0 : i32
    return %arg0, %arg1, %c0_i32, %c0_i32_0 : i32, i32, i32, i32
  }
}

</mosaic_0001>

<bundles_post_ra>
// kernel: focal_tversky_loss.1
= control target key start
LH: loop header
LB: loop body
LE: loop exit
PB: predicated region body
PF: predicated region fallthrough
CT: control target
= control target key end

     0   :  { %s547_s9 = smov 0   ;;  %s549_s10 = smov 0   ;;  %s587_s0 = inlined_call_operand.vmem [shape: f32[2,8,128], index: 0, kind: input, shape index: {}]   ;;  %s588_s1 = inlined_call_operand.vmem [shape: f32[2,8,128], index: 1, kind: input, shape index: {}]   ;;  %s589_s2 = inlined_call_operand.vmem [shape: f32[2,1,3,128], index: 2, kind: output, shape index: {}]  }
   0x1   :  { %s551_s11 = smov 0  }
   0x2 LB: > { %s24_s12 = sadd.s32 1, %s526_s10  ;;  %p478_p0 = scmp.ge.s32.totalorder %s530_s11, 1  ;;  %s530_s11 = sphi %s551_s11, %s12_s11   ;;  %s526_s10 = sphi %s549_s10, %s591_s10   ;;  %s522_s9 = sphi %s547_s9, %s590_s9  }
   0x3   : > { %p26_p1 = scmp.ge.s32.totalorder %s24_s12, 2  ;;  %p156_p2 = scmp.lt.s32.totalorder %s530_s11, 3 }
   0x5   : > { %s593_s12 = smov (%p26_p1, %s24_s12), 0  ;;  %p157_p3 = pnand %p478_p0, %p156_p2 }
   0x6   : > { %p198_p4 = scmp.lt.s32.totalorder (!%p157_p3), %s522_s9, 1  ;;  %v305_v0 = vlaneseq (!%p157_p3)  ;;  %vm380_vm4 = vcmask (!%p157_p3), 1040384   ;;  %vm382_vm5 = vcmask (!%p157_p3), 1041408  }
   0x7   : > { %160 = sbr.rel (%p157_p3) target bundleno = 42 (0x2a), region = 28 }
   0x8   : > { %v306_v1 = vshrl.u32 (!%p157_p3), %v305_v0, 7  ;;  %v311_v2 = vand.u32 (!%p157_p3), 127, %v305_v0 }
   0xa   : > { %v307_v3 = vadd.s32 (!%p157_p3), 8, %v306_v1  ;;  %v308_v4 = vadd.s32 (!%p157_p3), 16, %v306_v1  ;;  %v309_v5 = vadd.s32 (!%p157_p3), 24, %v306_v1  ;;  %v312_v6 = vmul.u32 (!%p157_p3), 128, %v306_v1 }
   0xc   : > { %v313_v10 = vmul.u32 (!%p157_p3), 128, %v307_v3  ;;  %v314_v11 = vmul.u32 (!%p157_p3), 128, %v308_v4  ;;  %v321_v12 = vadd.s32 (!%p157_p3), %v312_v6, %v311_v2 }
   0xd   : > { %v315_v16 = vmul.u32 (!%p157_p3), 128, %v309_v5 }
   0xe   : > { %s595_s9 = smov (!%p198_p4, %s522_s9), 1  ;;  %v322_v20 = vadd.s32 %v313_v10, %v311_v2  ;;  %v323_v21 = vadd.s32 %v314_v11, %v311_v2  ;;  %vm325_vm0 = vcmp.lt.s32.totalorder %v321_v12, 1024 }
   0xf   : > { %s479_s13 = sshll.u32 %s595_s9, 3  ;;  %v324_v24 = vadd.s32 %v315_v16, %v311_v2  ;;  %s481_s20 = sshll.u32 %s595_s9, 2 }
  0x10   : > { %s204_s16 = scalar_lea.vmem %s587_s0, %s479_s13  ;;  %s217_s19 = scalar_lea.vmem %s588_s1, %s479_s13  ;;  %vm326_vm1 = vcmp.lt.s32.totalorder %v322_v20, 1024  ;;  %vm327_vm2 = vcmp.lt.s32.totalorder %v323_v21, 1024 }
  0x11   : > { %v292_v7 = vld [vmem:[%s204_s16] sm:$0xff]  ;;  %v293_v8 = vld [vmem:[%s204_s16 + $0x8] sm:$0xff]  ;;  %v294_v9 = vld [vmem:[%s204_s16 + $0x10] sm:$0xff]  ;;  %vm328_vm3 = vcmp.lt.s32.totalorder %v324_v24, 1024  ;;  %s227_s23 = scalar_lea.vmem %s589_s2, %s481_s20 }
  0x12   : > { %v295_v13 = vld [vmem:[%s204_s16 + $0x18] sm:$0xff]  ;;  %v296_v14 = vld [vmem:[%s217_s19] sm:$0xff]  ;;  %v297_v15 = vld [vmem:[%s217_s19 + $0x8] sm:$0xff]  ;;  %v329_v26 = vsel %vm325_vm0, %v292_v7, 0.0  ;;  %v330_v27 = vsel %vm326_vm1, %v293_v8, 0.0  ;;  %v331_v30 = vsel %vm327_vm2, %v294_v9, 0.0 }
  0x13   : > { %v298_v17 = vld [vmem:[%s217_s19 + $0x10] sm:$0xff]  ;;  %v299_v18 = vld [vmem:[%s217_s19 + $0x18] sm:$0xff]  ;;  %v300_v19 = vmul.f32 %v296_v14, %v292_v7  ;;  %v301_v22 = vmul.f32 %v297_v15, %v293_v8  ;;  %v333_v28 = vsel %vm325_vm0, %v296_v14, 0.0  ;;  %v334_v29 = vsel %vm326_vm1, %v297_v15, 0.0 }
  0x14   : > { %v302_v23 = vmul.f32 %v298_v17, %v294_v9  ;;  %v303_v25 = vmul.f32 %v299_v18, %v295_v13  ;;  %v335_v32 = vsel %vm327_vm2, %v298_v17, 0.0  ;;  %v353_v35 = vadd.f32 %v330_v27, %v329_v26 }
  0x15   : > { %v337_v31 = vsel %vm325_vm0, %v300_v19, 0.0  ;;  %v338_v33 = vsel %vm326_vm1, %v301_v22, 0.0  ;;  %v332_v36 = vsel %vm328_vm3, %v295_v13, 0.0  ;;  %v362_v37 = vadd.f32 %v334_v29, %v333_v28 }
  0x16   : > { %v339_v34 = vsel %vm327_vm2, %v302_v23, 0.0  ;;  %v371_v38 = vadd.f32 %v338_v33, %v337_v31  ;;  %v336_v39 = vsel %vm328_vm3, %v299_v18, 0.0  ;;  %v340_v40 = vsel %vm328_vm3, %v303_v25, 0.0 }
  0x17   : > { %v354_v41 = vadd.f32 %v353_v35, %v331_v30  ;;  %v363_v42 = vadd.f32 %v362_v37, %v335_v32 }
  0x18   : > { %v372_v43 = vadd.f32 %v371_v38, %v339_v34 }
  0x19   : > { %v355_v44 = vadd.f32 %v354_v41, %v332_v36  ;;  %v364_v45 = vadd.f32 %v363_v42, %v336_v39 }
  0x1a   : > { %v373_v46 = vadd.f32 %v372_v43, %v340_v40 }
  0x1b   : > { %v356_v47 = vrot.slane %v355_v44, 4  ;;  %v365_v48 = vrot.slane %v364_v45, 4 }
  0x1c   : > { %v374_v49 = vrot.slane %v373_v46, 4 }
  0x1d   : > { %v357_v50 = vadd.f32 %v356_v47, %v355_v44  ;;  %v366_v51 = vadd.f32 %v365_v48, %v364_v45 }
  0x1e   : > { %v375_v52 = vadd.f32 %v374_v49, %v373_v46 }
  0x1f   : > { %v358_v53 = vrot.slane %v357_v50, 2  ;;  %v367_v54 = vrot.slane %v366_v51, 2 }
  0x20   : > { %v376_v55 = vrot.slane %v375_v52, 2 }
  0x21   : > { %v359_v56 = vadd.f32 %v358_v53, %v357_v50  ;;  %v368_v57 = vadd.f32 %v367_v54, %v366_v51 }
  0x22   : > { %v377_v58 = vadd.f32 %v376_v55, %v375_v52 }
  0x23   : > { %v360_v59 = vrot.slane %v359_v56, 1  ;;  %v369_v60 = vrot.slane %v368_v57, 1 }
  0x24   : > { %v378_v61 = vrot.slane %v377_v58, 1 }
  0x25   : > { %v361_v62 = vadd.f32 %v360_v59, %v359_v56  ;;  %v370_v63 = vadd.f32 %v369_v60, %v368_v57 }
  0x26   : > { %v379_v0 = vadd.f32 %v378_v61, %v377_v58 }
  0x27   : > { %v381_v1 = vsel %vm380_vm4, %v361_v62, %v370_v63 }
  0x28   : > { %v383_v2 = vsel %vm382_vm5, %v381_v1, %v379_v0 }
  0x29   : > { %384 = vst [vmem:[%s227_s23] sm:$0x7] %v383_v2 }
  0x2a PF: > { %s12_s11 = sadd.s32 1, %s530_s11   ;;  %s590_s9 = smov %s526_s10 }
  0x2b   : > { %p9_p5 = scmp.ge.s32.totalorder %s12_s11, 4   ;;  %s591_s10 = smov %s593_s12 }
  0x2d   :  { %11 = sbr.rel (!%p9_p5) target bundleno = 2 (0x2), region = 69 }

</bundles_post_ra>
